<compile_context>
chip_gen: v5e
topology: v5e:2x2
jax: 0.10.0
libtpu: 0.0.40
codegen_flags: <defaults>
</compile_context>

<pallas_src>
import functools

import jax
import jax.numpy as jnp
from jax.experimental import pallas as pl
from jax.experimental.pallas import tpu as pltpu


_LANE_WIDTHS = (1024, 512, 256, 128)        # candidate lane-dense slab widths
_DEFAULT_BLOCK_BYTES = 4 * 1024 * 1024      # v6e sweet spot / low end of v7x range
_V7X_BLOCK_BYTES = 8 * 1024 * 1024          # bigger steps amortize ~0.35us/step overhead
_VMEM_LIMIT_BYTES = 48 * 1024 * 1024        # covers 2 bufs x (in+out) x block on all gens
                                            # (v5e/v6e: 128 MiB phys, v7x: 64 MiB phys)


def _bias_add_kernel(bias_ref, x_ref, o_ref):
    # bias_ref: (1,) f32 scalar in SMEM.  Cast to the tile dtype so bf16/fp8
    # tiles are not promoted to f32 inside the kernel (matches PyTorch's
    # promotion for a 0-dim float param + low-precision tensor).
    o_ref[...] = x_ref[...] + bias_ref[0].astype(x_ref.dtype)


@functools.lru_cache(maxsize=1)
def _target_block_bytes() -> int:
    """Per-generation block size; conservative default if the HW query fails."""
    block_bytes = _DEFAULT_BLOCK_BYTES
    try:
        vmem_cap = int(pltpu.get_tpu_info().vmem_capacity_bytes)
        if 0 < vmem_cap <= 64 * 1024 * 1024:      # v7x-class TensorCore
            block_bytes = _V7X_BLOCK_BYTES
    except Exception:
        pass
    return block_bytes


def _bias_add_pallas(x2d: jax.Array, bias_scalar: jax.Array) -> jax.Array:
    rows, width = x2d.shape
    itemsize = jnp.dtype(x2d.dtype).itemsize
    bytes_per_row = width * itemsize

    # Rows per block: multiple of 32 (covers f32 (8,128), bf16 (16,128),
    # int8/fp8 (32,128) packed sublane tiles).  A single full-array block is
    # exempt from the divisibility rule.
    tile_m = max(32, (_target_block_bytes() // bytes_per_row) // 32 * 32)
    if rows <= tile_m:
        tile_m = rows
    grid = (pl.cdiv(rows, tile_m),)

    total = rows * width
    cost = pl.CostEstimate(
        flops=total,
        transcendentals=0,
        bytes_accessed=2 * total * itemsize,
    )

    return pl.pallas_call(
        _bias_add_kernel,
        out_shape=jax.ShapeDtypeStruct((rows, width), x2d.dtype),
        grid=grid,
        in_specs=[
            pl.BlockSpec(memory_space=pltpu.MemorySpace.SMEM),   # scalar bias
            pl.BlockSpec((tile_m, width), lambda i: (i, 0)),     # x row-tile
        ],
        out_specs=pl.BlockSpec((tile_m, width), lambda i: (i, 0)),
        # NOTE: no input_output_aliases -- if the caller still uses x, XLA adds
        # a full copy to satisfy the must-alias, erasing any benefit.
        compiler_params=pltpu.CompilerParams(
            # v7x: shard the row loop across both TensorCores; neutral on 1-TC chips.
            # TODO(synk): if xprof shows single-TC execution on v7x, switch this
            # axis to pltpu.CORE_PARALLEL.
            dimension_semantics=("parallel",),
            vmem_limit_bytes=_VMEM_LIMIT_BYTES,
        ),
        cost_estimate=cost,
    )(bias_scalar, x2d)


def _lane_dense_width(total: int):
    for w in _LANE_WIDTHS:
        if total % w == 0:
            return w
    return None


class BiasPallas:
    """JAX/Pallas equivalent of the PyTorch `Bias` module."""

    def __init__(self, bias: float = 0.0, use_bias: bool = False,
                 min_pallas_elems: int = 1 << 20):
        self.use_bias = use_bias
        # Matches nn.Parameter(torch.tensor(bias, dtype=torch.float)).
        self.bias = jnp.asarray(bias, dtype=jnp.float32) if use_bias else None
        # A scalar add is a textbook fusion candidate; below this element count
        # the standalone pallas_call (a fusion barrier + fixed launch cost) is
        # not worth it, so let XLA fuse the add into neighbouring ops.
        self.min_pallas_elems = min_pallas_elems

    def __call__(self, x: jax.Array) -> jax.Array:
        if not self.use_bias:
            return x  # identity path: no kernel needed

        total = x.size
        width = _lane_dense_width(total)
        if total < self.min_pallas_elems or width is None:
            # Small or ragged (element count not a multiple of 128): plain fused
            # XLA add.  Replaces the old pad+kernel+slice path, which cost up to
            # two extra full-tensor HBM passes for this memory-bound op.
            return x + self.bias.astype(x.dtype)

        # Free view (row-major reshape, no copy): lane-dense (rows, width) slab,
        # so every vector store is a full unmasked 128-lane store.
        x2d = x.reshape((-1, width))
        y2d = _bias_add_pallas(x2d, self.bias.reshape((1,)))
        return y2d.reshape(x.shape)


if __name__ == "__main__":
    key = jax.random.PRNGKey(0)
    # NCHW input as the module would see from a conv head: batch=2, channels=4, 16x16.
    x = jax.random.normal(key, (2, 4, 16, 16), dtype=jnp.float32)

    # use_bias=True; min_pallas_elems=0 forces the Pallas kernel at this small
    # demo shape (2048 elems -> lane-dense (2, 1024) slab, single full block).
    mod = BiasPallas(bias=0.5, use_bias=True, min_pallas_elems=0)
    y = jax.block_until_ready(mod(x))
    assert jnp.allclose(y, x + 0.5, atol=1e-6), "bias-add mismatch"

    # Ragged element count (210, not a multiple of 128): takes the fused XLA
    # fallback instead of pad+kernel+slice; semantics unchanged.
    x_odd = jax.random.normal(jax.random.PRNGKey(1), (2, 3, 5, 7), dtype=jnp.float32)
    mod_odd = BiasPallas(bias=-1.25, use_bias=True, min_pallas_elems=0)
    y_odd = jax.block_until_ready(mod_odd(x_odd))
    assert jnp.allclose(y_odd, x_odd - 1.25, atol=1e-6), "ragged bias-add mismatch"

    # use_bias=False path (identity).
    mod_id = BiasPallas(use_bias=False)
    y_id = jax.block_until_ready(mod_id(x))
    assert jnp.allclose(y_id, x), "identity mismatch"

    print("KERNEL_OK")
</pallas_src>

<mosaic_0001>
module attributes {stable_mosaic.version = 11 : i64} {
  func.func @_bias_add_kernel(%arg0: i32, %arg1: memref<1xf32, #tpu.memory_space<smem>>, %arg2: memref<2x1024xf32, #tpu.memory_space<vmem>>, %arg3: memref<2x1024xf32, #tpu.memory_space<vmem>>) attributes {dimension_semantics = [#tpu.dimension_semantics<parallel>], iteration_bounds = array<i64: 1>, scalar_prefetch = 0 : i64, scratch_operands = 0 : i64, tpu.core_type = #tpu.core_type<tc>, window_params = [{transform_indices = @transform_0, window_bounds = array<i64: 1>}, {transform_indices = @transform_1, window_bounds = array<i64: 2, 1024>}, {transform_indices = @transform_2, window_bounds = array<i64: 2, 1024>}]} {
    %c0 = arith.constant 0 : index
    %c0_0 = arith.constant 0 : index
    %0 = vector.load %arg2[%c0, %c0_0] : memref<2x1024xf32, #tpu.memory_space<vmem>>, vector<2x1024xf32>
    %c0_1 = arith.constant 0 : index
    %1 = memref.load %arg1[%c0_1] : memref<1xf32, #tpu.memory_space<smem>>
    %2 = vector.broadcast %1 : f32 to vector<2x1024xf32>
    %3 = arith.addf %0, %2 : vector<2x1024xf32>
    %c0_2 = arith.constant 0 : index
    %c0_3 = arith.constant 0 : index
    %4 = vector.load %arg3[%c0_2, %c0_3] : memref<2x1024xf32, #tpu.memory_space<vmem>>, vector<2x1024xf32>
    tpu.vector_store %arg3[%c0_2, %c0_3], %3 {strides = array<i32>} : memref<2x1024xf32, #tpu.memory_space<vmem>>, vector<2x1024xf32>,
    return
  }
  func.func @transform_0(%arg0: i32) -> i32 {
    %c0_i32 = arith.constant 0 : i32
    %c0_i32_0 = arith.constant 0 : i32
    return %c0_i32 : i32
  }
  func.func @transform_1(%arg0: i32) -> (i32, i32) {
    %c0_i32 = arith.constant 0 : i32
    %c0_i32_0 = arith.constant 0 : i32
    return %arg0, %c0_i32 : i32, i32
  }
  func.func @transform_2(%arg0: i32) -> (i32, i32) {
    %c0_i32 = arith.constant 0 : i32
    %c0_i32_0 = arith.constant 0 : i32
    return %arg0, %c0_i32 : i32, i32
  }
}

</mosaic_0001>

<bundles_post_ra>
// kernel: tpu_custom_call.1
= control target key start
LH: loop header
LB: loop body
LE: loop exit
PB: predicated region body
PF: predicated region fallthrough
CT: control target
= control target key end

     0   :  { %8 = vsyncpa [#allocation4], 0  ;;  %s132_s0 = inlined_call_operand.<no memory space> [shape: f32[1], index: 0, kind: input, shape index: {}]   ;;  %s133_s1 = inlined_call_operand.hbm [shape: f32[2,1024], index: 1, kind: input, shape index: {}]   ;;  %s134_s2 = inlined_call_operand.hbm [shape: f32[2,1024], index: 2, kind: output, shape index: {}]  }
   0x1   :  { %9 = vsyncpa [#allocation5], 0  ;;  %s17_s11 = sshll.u32 %s133_s1, 4  ;;  %s106_s12 = smov [#allocation3]   ;;  %s18_s11 = int_to_ptr.hbm [resolvable:$true] %s17_s11 }
   0x2   :  { %s19_s13 = sshll.u32 %s106_s12, 4  ;;  %s20_s13 = int_to_ptr.vmem [resolvable:$true] %s19_s13 }
   0x3   :  { %22 = dma.hbm_to_vmem [thread:$0]  %s18_s11, 256, %s20_s13, [#allocation4]  }
   0x4   :  { %102 = dma.done.wait [#allocation4], 256  }
   0x5   :  { %103 = vsyncadd [#allocation4], 4294967040  ;;  %v30_v0 = vstv %s132_s0  ;;  %s107_s16 = smov [#allocation6]   ;;  %s42_s20 = sshll.u32 %s134_s2, 4  ;;  %v27_v1 = vld [vmem:[#allocation3] sm:$0xff]  ;;  %v28_v2 = vld [vmem:[#allocation3 + $0x8] sm:$0xff]  ;;  %s43_s20 = int_to_ptr.hbm [resolvable:$true] %s42_s20 }
   0x6   :  { %s40_s17 = sshll.u32 %s107_s16, 4  ;;  %v31_v3 = vadd.f32 %v30_v0, %v27_v1  ;;  %v32_v4 = vadd.f32 %v30_v0, %v28_v2  ;;  %s41_s17 = int_to_ptr.vmem [resolvable:$true] %s40_s17 }
   0x8   :  { %33 = vst [vmem:[#allocation6] sm:$0xff] %v31_v3 }
   0x9   :  { %34 = vst [vmem:[#allocation6 + $0x8] sm:$0xff] %v32_v4 }
   0xa   :  { %45 = dma.vmem_to_hbm [thread:$0]  %s41_s17, 256, %s43_s20, [#allocation5]  }
   0xb   :  { %104 = dma.done.wait [#allocation5], 256  }
   0xc   :  { %105 = vsyncadd [#allocation5], 4294967040 }
   0xd   :  { %50 = vsyncpa [#allocation4], 1 }
   0xe   :  { %51 = vsyncpa [#allocation5], 1 }

</bundles_post_ra>
